<compile_context>
chip_gen: v5e
topology: v5e:2x2
jax: 0.10.0
libtpu: 0.0.40
codegen_flags: <defaults>
</compile_context>

<pallas_src>
import functools

import jax
import jax.numpy as jnp
from jax import lax
from jax.experimental import pallas as pl
from jax.experimental.pallas import tpu as pltpu


def _round_up(x, m):
    return ((x + m - 1) // m) * m


# ---------------------------------------------------------------------------
# Pallas kernel: whole-batch 3x3 "same" conv as ONE stacked-K MXU matmul.
# ---------------------------------------------------------------------------
def _conv_stacked_kernel(x_ref, w_ref, b_ref, o_ref, xs_ref, *, shifts):
    """x_ref : (R, L_IN)   R = imgs*Cin rows; zero-padded images, flat stride = WP.
       w_ref : (M, K)      M = imgs*Cout, K = n_taps*R; block-diagonal per image.
       b_ref : (M, 1)      f32 bias (per output-channel row).
       o_ref : (M, L_OUT)  channel-major flat output, L_OUT multiple of 128.
       xs_ref: (K, L_OUT)  VMEM scratch holding the tap-stacked operand.

    Output flat position p = h*WP + w; tap (kh, kw) reads input flat p + kh*WP + kw,
    so each tap is a static lane shift of the resident slab.  All shifts are hoisted
    into one stacked operand built once, then the conv is a single MXU matmul with a
    float32 accumulator (no serialized dot+add chain).
    """
    r = x_ref.shape[0]
    l_out = o_ref.shape[1]
    x = x_ref[...]                                     # whole slab, resident in VMEM
    for t, d in enumerate(shifts):                     # static, fully unrolled
        xs_ref[t * r:(t + 1) * r, :] = x[:, d:d + l_out]
    acc = jnp.dot(w_ref[...], xs_ref[...], preferred_element_type=jnp.float32)
    o_ref[...] = (acc + b_ref[...]).astype(o_ref.dtype)


# ---------------------------------------------------------------------------
# tdLayer forward: SeqToANNContainer(Conv2d) semantics
# ---------------------------------------------------------------------------
def td_layer_conv2d(x_seq, weight, bias, *, num_blocks=1):
    """x_seq: [T, B, Cin, H, W]; weight: [Cout, Cin, KH, KW] (OIHW); bias: [Cout].

    Returns [T, B, Cout, H, W] (stride-1 'same' conv applied per time-step).
    num_blocks splits the T*B images over grid steps (set 2 on v7x so each
    TensorCore gets one block; 1 is best on single-core v5e/v6e).
    """
    T, B, Cin, H, W = x_seq.shape
    Cout, Cin_w, KH, KW = weight.shape
    assert Cin == Cin_w
    assert KH % 2 == 1 and KW % 2 == 1, "'same' conv path assumes odd kernel"
    NB = T * B
    assert NB % num_blocks == 0
    nper = NB // num_blocks                        # images per grid step

    ph, pw = (KH - 1) // 2, (KW - 1) // 2
    HP, WP = H + 2 * ph, W + 2 * pw
    n_taps = KH * KW
    max_shift = (KH - 1) * WP + (KW - 1)

    L_OUT = _round_up(H * WP, 128)                 # lane-dense flat output length
    L_IN = _round_up(L_OUT + max_shift, 128)       # + headroom for the largest shift
    assert L_IN >= L_OUT + max_shift               # tap slices must stay in-block
    assert L_IN >= HP * WP

    R = nper * Cin                                 # input rows per block (mult of 8 here)
    M = nper * Cout                                # output rows per block
    K = n_taps * R                                 # stacked contraction dim

    # ---- wrapper prep: reshape/pad only (no transpose, no im2col, no 9x expansion) ----
    x = x_seq.reshape(NB * Cin, H, W).astype(jnp.float32)
    xf = jnp.pad(x, ((0, 0), (ph, ph), (pw, pw))).reshape(NB * Cin, HP * WP)
    xf = jnp.pad(xf, ((0, 0), (0, L_IN - HP * WP)))
    xf = xf.reshape(num_blocks, R, L_IN)

    # Block-diagonal weight: rows (img, cout), cols (tap, img, cin).
    #   w_big[n*Cout+co, (t*nper+m)*Cin+c] = (n == m) * weight[co, c, kh, kw]
    w_t = jnp.transpose(weight, (2, 3, 0, 1)).reshape(n_taps, Cout, Cin)
    w_big = jnp.einsum("nm,toc->notmc",
                       jnp.eye(nper, dtype=jnp.float32), w_t.astype(jnp.float32))
    w_big = w_big.reshape(M, K)
    b_big = jnp.tile(bias, nper).reshape(M, 1).astype(jnp.float32)

    shifts = tuple(kh * WP + kw for kh in range(KH) for kw in range(KW))
    kernel = functools.partial(_conv_stacked_kernel, shifts=shifts)

    flops = 2 * NB * Cout * Cin * KH * KW * H * W
    bytes_accessed = (xf.size * 4 + w_big.size * 4 + b_big.size * 4
                      + num_blocks * M * L_OUT * 4)

    out = pl.pallas_call(
        kernel,
        out_shape=jax.ShapeDtypeStruct((num_blocks, M, L_OUT), jnp.float32),
        grid_spec=pltpu.PrefetchScalarGridSpec(
            num_scalar_prefetch=0,
            grid=(num_blocks,),
            in_specs=[
                pl.BlockSpec((None, R, L_IN), lambda b: (b, 0, 0)),   # image slab
                pl.BlockSpec((M, K), lambda b: (0, 0)),               # weights (resident)
                pl.BlockSpec((M, 1), lambda b: (0, 0)),               # bias (resident)
            ],
            out_specs=pl.BlockSpec((None, M, L_OUT), lambda b: (b, 0, 0)),
            scratch_shapes=[pltpu.VMEM((K, L_OUT), jnp.float32)],
        ),
        compiler_params=pltpu.CompilerParams(
            dimension_semantics=("parallel",),     # v7x: shard blocks across 2 TCs
        ),
        cost_estimate=pl.CostEstimate(
            flops=flops, transcendentals=0, bytes_accessed=bytes_accessed),
    )(xf, w_big, b_big)

    # Crop the padded, channel-major flat output back to [T, B, Cout, H, W].
    # TODO(synk): for chained tdLayers, keep the padded (Cout, H*WP) channel-major
    # layout as the inter-layer interchange format and skip this crop/re-pad pass.
    out = out.reshape(NB, Cout, L_OUT)[:, :, :H * WP]
    out = out.reshape(NB, Cout, H, WP)[:, :, :, :W]
    return out.reshape(T, B, Cout, H, W)


if __name__ == "__main__":
    # Shapes implied by the forward: time dim + batch + NCHW image.
    T, B, Cin, Cout, H, W, Ksz = 2, 2, 4, 8, 16, 16, 3

    key = jax.random.PRNGKey(0)
    kx, kw_, kb = jax.random.split(key, 3)
    x_seq = jax.random.normal(kx, (T, B, Cin, H, W), dtype=jnp.float32)
    # Deterministic synthetic parameters (no checkpoint load).
    weight = 0.1 * jax.random.normal(kw_, (Cout, Cin, Ksz, Ksz), dtype=jnp.float32)
    bias = 0.1 * jax.random.normal(kb, (Cout,), dtype=jnp.float32)

    y = jax.block_until_ready(jax.jit(td_layer_conv2d)(x_seq, weight, bias))
    assert y.shape == (T, B, Cout, H, W)

    # Reference: SeqToANNContainer(Conv2d) == per-time-step f32 'same' conv.
    x_flat = x_seq.reshape(T * B, Cin, H, W)
    y_ref = lax.conv_general_dilated(
        x_flat, weight, window_strides=(1, 1), padding=((1, 1), (1, 1)),
        dimension_numbers=("NCHW", "OIHW", "NCHW"),
        precision=lax.Precision.HIGHEST,
    ) + bias.reshape(1, Cout, 1, 1)
    y_ref = y_ref.reshape(T, B, Cout, H, W)

    # f32 operands + f32 accumulation: error is typically ~1e-6; the loose tolerance
    # only guards against lower-precision MXU matmul passes on older generations.
    assert jnp.allclose(y, y_ref, atol=3e-2, rtol=3e-2), "mismatch vs f32 reference conv"
    print("KERNEL_OK")
</pallas_src>

<mosaic_0001>
module attributes {stable_mosaic.version = 11 : i64} {
  func.func @_conv_stacked_kernel(%arg0: i32, %arg1: memref<1x16x512xf32, #tpu.memory_space<vmem>>, %arg2: memref<32x144xf32, #tpu.memory_space<vmem>>, %arg3: memref<32x1xf32, #tpu.memory_space<vmem>>, %arg4: memref<1x32x384xf32, #tpu.memory_space<vmem>>, %arg5: memref<144x384xf32, #tpu.memory_space<vmem>>) attributes {dimension_semantics = [#tpu.dimension_semantics<parallel>], iteration_bounds = array<i64: 1>, scalar_prefetch = 0 : i64, scratch_operands = 1 : i64, tpu.core_type = #tpu.core_type<tc>, window_params = [{transform_indices = @transform_0, window_bounds = array<i64: 1, 16, 512>}, {pipeline_mode = #tpu.pipeline_mode<synchronous>, transform_indices = @transform_1, window_bounds = array<i64: 32, 144>}, {pipeline_mode = #tpu.pipeline_mode<synchronous>, transform_indices = @transform_2, window_bounds = array<i64: 32, 1>}, {transform_indices = @transform_3, window_bounds = array<i64: 1, 32, 384>}]} {
    %c0 = arith.constant 0 : index
    %c0_0 = arith.constant 0 : index
    %c0_1 = arith.constant 0 : index
    %0 = vector.load %arg1[%c0, %c0_0, %c0_1] : memref<1x16x512xf32, #tpu.memory_space<vmem>>, vector<1x16x512xf32>
    %1 = vector.shape_cast %0 : vector<1x16x512xf32> to vector<16x512xf32>
    %2 = vector.extract_strided_slice %1 {offsets = [0, 0], sizes = [16, 384], strides = [1, 1]} : vector<16x512xf32> to vector<16x384xf32>
    %c0_2 = arith.constant 0 : index
    %c0_3 = arith.constant 0 : index
    %3 = vector.load %arg5[%c0_2, %c0_3] : memref<144x384xf32, #tpu.memory_space<vmem>>, vector<16x384xf32>
    tpu.vector_store %arg5[%c0_2, %c0_3], %2 {strides = array<i32>} : memref<144x384xf32, #tpu.memory_space<vmem>>, vector<16x384xf32>,
    %4 = vector.extract_strided_slice %1 {offsets = [0, 1], sizes = [16, 384], strides = [1, 1]} : vector<16x512xf32> to vector<16x384xf32>
    %c16 = arith.constant 16 : index
    %c0_4 = arith.constant 0 : index
    %5 = vector.load %arg5[%c16, %c0_4] : memref<144x384xf32, #tpu.memory_space<vmem>>, vector<16x384xf32>
    tpu.vector_store %arg5[%c16, %c0_4], %4 {strides = array<i32>} : memref<144x384xf32, #tpu.memory_space<vmem>>, vector<16x384xf32>,
    %6 = vector.extract_strided_slice %1 {offsets = [0, 2], sizes = [16, 384], strides = [1, 1]} : vector<16x512xf32> to vector<16x384xf32>
    %c32 = arith.constant 32 : index
    %c0_5 = arith.constant 0 : index
    %7 = vector.load %arg5[%c32, %c0_5] : memref<144x384xf32, #tpu.memory_space<vmem>>, vector<16x384xf32>
    tpu.vector_store %arg5[%c32, %c0_5], %6 {strides = array<i32>} : memref<144x384xf32, #tpu.memory_space<vmem>>, vector<16x384xf32>,
    %8 = vector.extract_strided_slice %1 {offsets = [0, 18], sizes = [16, 384], strides = [1, 1]} : vector<16x512xf32> to vector<16x384xf32>
    %c48 = arith.constant 48 : index
    %c0_6 = arith.constant 0 : index
    %9 = vector.load %arg5[%c48, %c0_6] : memref<144x384xf32, #tpu.memory_space<vmem>>, vector<16x384xf32>
    tpu.vector_store %arg5[%c48, %c0_6], %8 {strides = array<i32>} : memref<144x384xf32, #tpu.memory_space<vmem>>, vector<16x384xf32>,
    %10 = vector.extract_strided_slice %1 {offsets = [0, 19], sizes = [16, 384], strides = [1, 1]} : vector<16x512xf32> to vector<16x384xf32>
    %c64 = arith.constant 64 : index
    %c0_7 = arith.constant 0 : index
    %11 = vector.load %arg5[%c64, %c0_7] : memref<144x384xf32, #tpu.memory_space<vmem>>, vector<16x384xf32>
    tpu.vector_store %arg5[%c64, %c0_7], %10 {strides = array<i32>} : memref<144x384xf32, #tpu.memory_space<vmem>>, vector<16x384xf32>,
    %12 = vector.extract_strided_slice %1 {offsets = [0, 20], sizes = [16, 384], strides = [1, 1]} : vector<16x512xf32> to vector<16x384xf32>
    %c80 = arith.constant 80 : index
    %c0_8 = arith.constant 0 : index
    %13 = vector.load %arg5[%c80, %c0_8] : memref<144x384xf32, #tpu.memory_space<vmem>>, vector<16x384xf32>
    tpu.vector_store %arg5[%c80, %c0_8], %12 {strides = array<i32>} : memref<144x384xf32, #tpu.memory_space<vmem>>, vector<16x384xf32>,
    %14 = vector.extract_strided_slice %1 {offsets = [0, 36], sizes = [16, 384], strides = [1, 1]} : vector<16x512xf32> to vector<16x384xf32>
    %c96 = arith.constant 96 : index
    %c0_9 = arith.constant 0 : index
    %15 = vector.load %arg5[%c96, %c0_9] : memref<144x384xf32, #tpu.memory_space<vmem>>, vector<16x384xf32>
    tpu.vector_store %arg5[%c96, %c0_9], %14 {strides = array<i32>} : memref<144x384xf32, #tpu.memory_space<vmem>>, vector<16x384xf32>,
    %16 = vector.extract_strided_slice %1 {offsets = [0, 37], sizes = [16, 384], strides = [1, 1]} : vector<16x512xf32> to vector<16x384xf32>
    %c112 = arith.constant 112 : index
    %c0_10 = arith.constant 0 : index
    %17 = vector.load %arg5[%c112, %c0_10] : memref<144x384xf32, #tpu.memory_space<vmem>>, vector<16x384xf32>
    tpu.vector_store %arg5[%c112, %c0_10], %16 {strides = array<i32>} : memref<144x384xf32, #tpu.memory_space<vmem>>, vector<16x384xf32>,
    %18 = vector.extract_strided_slice %1 {offsets = [0, 38], sizes = [16, 384], strides = [1, 1]} : vector<16x512xf32> to vector<16x384xf32>
    %c128 = arith.constant 128 : index
    %c0_11 = arith.constant 0 : index
    %19 = vector.load %arg5[%c128, %c0_11] : memref<144x384xf32, #tpu.memory_space<vmem>>, vector<16x384xf32>
    tpu.vector_store %arg5[%c128, %c0_11], %18 {strides = array<i32>} : memref<144x384xf32, #tpu.memory_space<vmem>>, vector<16x384xf32>,
    %c0_12 = arith.constant 0 : index
    %c0_13 = arith.constant 0 : index
    %20 = vector.load %arg2[%c0_12, %c0_13] : memref<32x144xf32, #tpu.memory_space<vmem>>, vector<32x144xf32>
    %c0_14 = arith.constant 0 : index
    %c0_15 = arith.constant 0 : index
    %21 = vector.load %arg5[%c0_14, %c0_15] : memref<144x384xf32, #tpu.memory_space<vmem>>, vector<144x384xf32>
    %cst = arith.constant dense<0.000000e+00> : vector<32x384xf32>
    %22 = tpu.matmul %20, %21, %cst {dimension_numbers = #tpu.dot_dimension_numbers<[1], [0], [0], [1], [0, 0, 1, 1], [], []>} : vector<32x144xf32>, vector<144x384xf32>, vector<32x384xf32> -> vector<32x384xf32>
    %c0_16 = arith.constant 0 : index
    %c0_17 = arith.constant 0 : index
    %23 = vector.load %arg3[%c0_16, %c0_17] : memref<32x1xf32, #tpu.memory_space<vmem>>, vector<32x1xf32>
    %24 = vector.broadcast %23 : vector<32x1xf32> to vector<32x384xf32>
    %25 = arith.addf %22, %24 : vector<32x384xf32>
    %c0_18 = arith.constant 0 : index
    %c0_19 = arith.constant 0 : index
    %c0_20 = arith.constant 0 : index
    %26 = vector.load %arg4[%c0_18, %c0_19, %c0_20] : memref<1x32x384xf32, #tpu.memory_space<vmem>>, vector<1x32x384xf32>
    %27 = vector.shape_cast %26 : vector<1x32x384xf32> to vector<32x384xf32>
    %28 = vector.shape_cast %25 : vector<32x384xf32> to vector<1x32x384xf32>
    tpu.vector_store %arg4[%c0_18, %c0_19, %c0_20], %28 {strides = array<i32>} : memref<1x32x384xf32, #tpu.memory_space<vmem>>, vector<1x32x384xf32>,
    return
  }
  func.func @transform_0(%arg0: i32) -> (i32, i32, i32) {
    %c0_i32 = arith.constant 0 : i32
    %c0_i32_0 = arith.constant 0 : i32
    %c0_i32_1 = arith.constant 0 : i32
    return %arg0, %c0_i32, %c0_i32_0 : i32, i32, i32
  }
  func.func @transform_1(%arg0: i32) -> (i32, i32) {
    %c0_i32 = arith.constant 0 : i32
    %c0_i32_0 = arith.constant 0 : i32
    %c0_i32_1 = arith.constant 0 : i32
    return %c0_i32, %c0_i32_0 : i32, i32
  }
  func.func @transform_2(%arg0: i32) -> (i32, i32) {
    %c0_i32 = arith.constant 0 : i32
    %c0_i32_0 = arith.constant 0 : i32
    %c0_i32_1 = arith.constant 0 : i32
    return %c0_i32, %c0_i32_0 : i32, i32
  }
  func.func @transform_3(%arg0: i32) -> (i32, i32, i32) {
    %c0_i32 = arith.constant 0 : i32
    %c0_i32_0 = arith.constant 0 : i32
    %c0_i32_1 = arith.constant 0 : i32
    return %arg0, %c0_i32, %c0_i32_0 : i32, i32, i32
  }
}

</mosaic_0001>

<bundles_post_ra>
// kernel: tile.8
= control target key start
LH: loop header
LB: loop body
LE: loop exit
PB: predicated region body
PF: predicated region fallthrough
CT: control target
= control target key end

     0   :  { %s22_s0 = inlined_call_operand.vmem [shape: f32[8], index: 0, kind: input, shape index: {}]   ;;  %s23_s1 = inlined_call_operand.vmem [shape: f32[4,8], index: 1, kind: output, shape index: {}]  }
   0x1   :  { %v4_v0 = vld [vmem:[%s22_s0] ss:$0 sm:$0xff] }
   0x2   :  { %5 = vst [vmem:[%s23_s1] sm:$0xf] %v4_v0 }

// kernel: tile.0
= control target key start
LH: loop header
LB: loop body
LE: loop exit
PB: predicated region body
PF: predicated region fallthrough
CT: control target
= control target key end

     0   :  { %s66_s8 = smov 125   ;;  %s67_s9 = smov 123   ;;  %vm7_vm0 = vcmask 7168   ;;  %s117_s0 = inlined_call_operand.vmem [shape: f32[4,8], index: 0, kind: input, shape index: {}]   ;;  %s118_s1 = inlined_call_operand.vmem [shape: f32[32,1], index: 1, kind: output, shape index: {}]  }
   0x1   :  { %v4_v0 = vld [vmem:[%s117_s0] sm:$0xf]  ;;  %s65_s0 = smov 127   ;;  %s68_s10 = smov 126  }
   0x2   :  { %5 = vst [vmem:[#allocation0] sm:$0xf] %v4_v0  ;;  %s69_s11 = smov 124   ;;  %s70_s12 = smov 122  }
   0x3   :  { %s71_s13 = smov 121  }
   0x9   :  { %v9_v1 = vld [vmem:[#allocation0] sm:$0xf]  }
   0xa   :  { %v21_v2 = vld [vmem:[#allocation0] sm:$0xf]   ;;  %10 = vrot.lane.b32.xlu0 %v9_v1, %s65_s0 }
   0xb   :  { %22 = vrot.lane.b32.xlu1 %v21_v2, %s66_s8  ;;  %v33_v3 = vld [vmem:[#allocation0] sm:$0xf]  }
   0xc   :  { %34 = vrot.lane.b32.xlu2 %v33_v3, %s67_s9  ;;  %v15_v4 = vld [vmem:[#allocation0] sm:$0xf]  }
   0xd   :  { %v27_v5 = vld [vmem:[#allocation0] sm:$0xf]  }
   0xe   :  { %v39_v6 = vld [vmem:[#allocation0] sm:$0xf]  }
   0xf   :  { %v45_v7 = vld [vmem:[#allocation0] sm:$0xf]  }
  0x10   :  { %v6_v8 = vld [vmem:[#allocation0] sm:$0xf]  }
  0x11   :  { %8 = vst.msk [vmem:[%s118_s1] ss:$8 sm:$0xf] %vm7_vm0, %v6_v8  }
  0x12   :  { %16 = vrot.lane.b32.xlu0 %v15_v4, %s68_s10 }
  0x13   :  { %28 = vrot.lane.b32.xlu1 %v27_v5, %s69_s11 }
  0x14   :  { %40 = vrot.lane.b32.xlu2 %v39_v6, %s70_s12 }
  0x1a   :  { %46 = vrot.lane.b32.xlu0 %v45_v7, %s71_s13 }
  0x66   :  { %v35_v9 = vpop.permute.xlu2 %34  }
  0x67   :  { %55 = vst.msk [vmem:[%s118_s1 + $0x5] ss:$8 sm:$0xf] %vm7_vm0, %v35_v9  }
  0x6e   :  { %v41_v10 = vpop.permute.xlu2 %40  }
  0x6f   :  { %56 = vst.msk [vmem:[%s118_s1 + $0x6] ss:$8 sm:$0xf] %vm7_vm0, %v41_v10  }
  0x7c   :  { %v11_v11 = vpop.permute.xlu0 %10  }
  0x7d   :  { %v23_v12 = vpop.permute.xlu1 %22   ;;  %51 = vst.msk [vmem:[%s118_s1 + $0x1] ss:$8 sm:$0xf] %vm7_vm0, %v11_v11  }
  0x7e   :  { %53 = vst.msk [vmem:[%s118_s1 + $0x3] ss:$8 sm:$0xf] %vm7_vm0, %v23_v12  }
  0x84   :  { %v17_v13 = vpop.permute.xlu0 %16  }
  0x85   :  { %v29_v14 = vpop.permute.xlu1 %28   ;;  %52 = vst.msk [vmem:[%s118_s1 + $0x2] ss:$8 sm:$0xf] %vm7_vm0, %v17_v13  }
  0x86   :  { %54 = vst.msk [vmem:[%s118_s1 + $0x4] ss:$8 sm:$0xf] %vm7_vm0, %v29_v14  }
  0x8c   :  { %v47_v15 = vpop.permute.xlu0 %46  }
  0x8d   :  { %57 = vst.msk [vmem:[%s118_s1 + $0x7] ss:$8 sm:$0xf] %vm7_vm0, %v47_v15  }

// kernel: td_layer_conv2d.1
= control target key start
LH: loop header
LB: loop body
LE: loop exit
PB: predicated region body
PF: predicated region fallthrough
CT: control target
= control target key end

     0   :  { %s789_s24 = smov 90   ;;  %s790_s25 = smov 91   ;;  %vm297_vm0 = vcmask 736256   ;;  %vm262_vm1 = vcmask 744448   ;;  %vm227_vm2 = vcmask 752640   ;;  %vm192_vm3 = vcmask 883712   ;;  %s1088_s0 = inlined_call_operand.vmem [shape: f32[1,16,512], index: 0, kind: input, shape index: {}]   ;;  %s1089_s1 = inlined_call_operand.vmem [shape: f32[32,144], index: 1, kind: input, shape index: {}]   ;;  %s1090_s2 = inlined_call_operand.vmem [shape: f32[32,1], index: 2, kind: input, shape index: {}]   ;;  %s1091_s3 = inlined_call_operand.vmem [shape: f32[1,32,384], index: 3, kind: output, shape index: {}]  }
   0x1   :  { %v821_v0 = vld [vmem:[%s1088_s0 + $0x28] sm:$0xff]  ;;  %v826_v1 = vld [vmem:[%s1088_s0 + $0x30] sm:$0xff]  ;;  %v843_v5 = vld [vmem:[%s1088_s0 + $0x20] sm:$0xff]  ;;  %s791_s28 = smov 92   ;;  %s792_s4 = smov 108   ;;  %vm402_vm4 = vcmask 130048  }
   0x2   :  { %v831_v2 = vld [vmem:[%s1088_s0 + $0x8] sm:$0xff]  ;;  %v626_v3 = vpack.i.bf16 %v826_v1, %v821_v0  ;;  %v838_v4 = vld [vmem:[%s1088_s0 + $0x10] sm:$0xff]  ;;  %v850_v7 = vld [vmem:[%s1088_s0] sm:$0xff]  ;;  %s793_s5 = smov 109   ;;  %s794_s6 = smov 110   ;;  %vm157_vm5 = vcmask 891904  }
   0x3   :  { %v636_v6 = vpack.i.bf16 %v838_v4, %v831_v2  ;;  %v646_v8 = vpack.i.bf16 %v850_v7, %v843_v5  ;;  %v21_v9 = vld [vmem:[%s1088_s0 + $0x38] sm:$0xff]  ;;  %s795_s7 = smov 126   ;;  %v904_v53 = vld [vmem:[%s1089_s1 + $0x8] sm:$0xff]  ;;  %vm122_vm6 = vcmask 900096   ;;  %vm87_vm7 = vcmask 1031168  }
   0x4   :  { %627 = vrot.lane.b32.xlu0 %v626_v3, %s789_s24  ;;  %v661_v10 = vpack.i.bf16 %v21_v9, %v843_v5  ;;  %v17_v11 = vld [vmem:[%s1088_s0 + $0x18] sm:$0xff]  ;;  %s796_s0 = smov 127   ;;  %vm52_vm8 = vcmask 1039360  }
   0x5   :  { %637 = vrot.lane.b32.xlu1 %v636_v6, %s789_s24  ;;  %647 = vrot.lane.b32.xlu2 %v646_v8, %s789_s24  ;;  %v671_v12 = vpack.i.bf16 %v17_v11, %v850_v7  ;;  %v776_v13 = vpack.i.bf16 %v17_v11, %v21_v9 }
   0xc   :  { %632 = vrot.lane.b32.xlu0 %v626_v3, %s790_s25 }
   0xd   :  { %642 = vrot.lane.b32.xlu1 %v636_v6, %s790_s25  ;;  %652 = vrot.lane.b32.xlu2 %v626_v3, %s791_s28 }
  0x14   :  { %657 = vrot.lane.b32.xlu0 %v636_v6, %s791_s28 }
  0x15   :  { %662 = vrot.lane.b32.xlu1 %v661_v10, %s790_s25  ;;  %667 = vrot.lane.b32.xlu2 %v626_v3, %s792_s4 }
  0x1c   :  { %672 = vrot.lane.b32.xlu0 %v671_v12, %s790_s25 }
  0x1d   :  { %677 = vrot.lane.b32.xlu1 %v636_v6, %s792_s4  ;;  %682 = vrot.lane.b32.xlu2 %v661_v10, %s791_s28 }
  0x24   :  { %687 = vrot.lane.b32.xlu0 %v626_v3, %s793_s5 }
  0x25   :  { %692 = vrot.lane.b32.xlu1 %v671_v12, %s791_s28  ;;  %697 = vrot.lane.b32.xlu2 %v636_v6, %s793_s5 }
  0x2c   :  { %702 = vrot.lane.b32.xlu0 %v661_v10, %s792_s4 }
  0x2d   :  { %707 = vrot.lane.b32.xlu1 %v626_v3, %s794_s6  ;;  %712 = vrot.lane.b32.xlu2 %v671_v12, %s792_s4 }
  0x34   :  { %717 = vrot.lane.b32.xlu0 %v636_v6, %s794_s6 }
  0x35   :  { %722 = vrot.lane.b32.xlu1 %v661_v10, %s793_s5  ;;  %727 = vrot.lane.b32.xlu2 %v626_v3, %s795_s7 }
  0x3c   :  { %732 = vrot.lane.b32.xlu0 %v671_v12, %s793_s5 }
  0x3d   :  { %737 = vrot.lane.b32.xlu1 %v636_v6, %s795_s7  ;;  %742 = vrot.lane.b32.xlu2 %v661_v10, %s794_s6 }
  0x44   :  { %747 = vrot.lane.b32.xlu0 %v626_v3, %s796_s0 }
  0x45   :  { %752 = vrot.lane.b32.xlu1 %v671_v12, %s794_s6  ;;  %757 = vrot.lane.b32.xlu2 %v636_v6, %s796_s0 }
  0x4c   :  { %762 = vrot.lane.b32.xlu0 %v661_v10, %s795_s7 }
  0x4d   :  { %767 = vrot.lane.b32.xlu1 %v671_v12, %s795_s7  ;;  %772 = vrot.lane.b32.xlu2 %v661_v10, %s796_s0 }
  0x54   :  { %777 = vrot.lane.b32.xlu0 %v776_v13, %s789_s24 }
  0x55   :  { %782 = vrot.lane.b32.xlu1 %v671_v12, %s796_s0  ;;  %v922_v12 = vld [vmem:[%s1089_s1 + $0x18] sm:$0xff] }
  0x5f   :  { %v648_v14 = vpop.permute.xlu2 %647 }
  0x60   :  { %v649_v16 = vunpack.i.l.bf16 %v648_v14  ;;  %v650_v17 = vunpack.i.h.bf16 %v648_v14 }
  0x67   :  { %v866_v15 = vpop.permute.xlu2 %652 }
  0x68   :  { %v655_v30 = vunpack.i.h.bf16 %v866_v15  ;;  %v654_v31 = vunpack.i.l.bf16 %v866_v15 }
  0x6a   :  { %v232_v39 = vsel %vm227_vm2, %v654_v31, %v655_v30 }
  0x6f   :  { %v880_v26 = vpop.permute.xlu2 %667 }
  0x70   :  { %v670_v41 = vunpack.i.h.bf16 %v880_v26  ;;  %v669_v42 = vunpack.i.l.bf16 %v880_v26  ;;  %v961_v26 = vld [vmem:[%s1089_s1 + $0x38] sm:$0xff] }
  0x72   :  { %v197_v50 = vsel %vm192_vm3, %v669_v42, %v670_v41 }
  0x76   :  { %v868_v18 = vpop.permute.xlu0 %627 }
  0x77   :  { %v630_v19 = vunpack.i.h.bf16 %v868_v18  ;;  %v629_v20 = vunpack.i.l.bf16 %v868_v18  ;;  %v872_v21 = vpop.permute.xlu1 %637  ;;  %v683_v40 = vpop.permute.xlu2 %682  ;;  %v320_v18 = vld [vmem:[%s1089_s1 + $0x20] sm:$0xff] }
  0x78   :  { %v640_v22 = vunpack.i.h.bf16 %v872_v21  ;;  %v639_v23 = vunpack.i.l.bf16 %v872_v21  ;;  %v685_v56 = vunpack.i.h.bf16 %v683_v40  ;;  %v684_v57 = vunpack.i.l.bf16 %v683_v40 }
  0x79   :  { %v301_v24 = vsel %vm297_vm0, %v649_v16, %v629_v20  ;;  %v302_v25 = vsel %vm297_vm0, %v629_v20, %v630_v19 }
  0x7a   :  { %458 = vmatpush.msra.mxu1 %v301_v24  ;;  %516 = vmatpush.msra.mxu3 %v302_v25  ;;  %v298_v27 = vsel %vm297_vm0, %v650_v17, %v639_v23  ;;  %v299_v28 = vsel %vm297_vm0, %v639_v23, %v640_v22  ;;  %v231_v8 = vsel %vm227_vm2, %v684_v57, %v654_v31 }
  0x7b   :  { %v233_v9 = vsel %vm227_vm2, %v655_v30, %v685_v56 }
  0x7c   :  { %459 = vmatpush.msra.mxu1 %v298_v27  ;;  %517 = vmatpush.msra.mxu3 %v299_v28 }
  0x7d   :  { %609 = vmatmul.msk.f32.vlgmr.msra.gmra.mxu3 %vm402_vm4, %v904_v53  ;;  %605 = vmatmul.msk.f32.vlgmr.msra.gmra.mxu1 %vm402_vm4, %v904_v53 }
  0x7e   :  { %v633_v29 = vpop.permute.xlu0 %632 }
  0x7f   :  { %v635_v32 = vunpack.i.h.bf16 %v633_v29  ;;  %v634_v33 = vunpack.i.l.bf16 %v633_v29  ;;  %v643_v34 = vpop.permute.xlu1 %642  ;;  %v906_v55 = vpop.permute.xlu2 %697  ;;  %v939_v29 = vld [vmem:[%s1089_s1 + $0x28] sm:$0xff] }
  0x80   :  { %v645_v35 = vunpack.i.h.bf16 %v643_v34  ;;  %v644_v36 = vunpack.i.l.bf16 %v643_v34  ;;  %v700_v10 = vunpack.i.h.bf16 %v906_v55  ;;  %v699_v11 = vunpack.i.l.bf16 %v906_v55 }
  0x81   :  { %v267_v37 = vsel %vm262_vm1, %v634_v33, %v635_v32 }
  0x82   :  { %473 = vmatpush.msra.mxu2 %v267_v37  ;;  %v264_v38 = vsel %vm262_vm1, %v644_v36, %v645_v35  ;;  %v159_v25 = vsel %vm157_vm5, %v699_v11, %v700_v10 }
  0x84   :  { %474 = vmatpush.msra.mxu2 %v264_v38 }
  0x85   :  { %610 = vmatmul.msk.f32.gmra.mxu3 %vm402_vm4, %v922_v12  ;;  %606 = vmatmul.msk.f32.gmra.mxu1 %vm402_vm4, %v922_v12 }
  0x86   :  { %v658_v43 = vpop.permute.xlu0 %657  ;;  %475 = vmatpush.msra.mxu2 %v232_v39 }
  0x87   :  { %v660_v44 = vunpack.i.h.bf16 %v658_v43  ;;  %v659_v45 = vunpack.i.l.bf16 %v658_v43  ;;  %v663_v46 = vpop.permute.xlu1 %662  ;;  %v713_v23 = vpop.permute.xlu2 %712 }
  0x88   :  { %v665_v47 = vunpack.i.h.bf16 %v663_v46  ;;  %v664_v48 = vunpack.i.l.bf16 %v663_v46  ;;  %v715_v31 = vunpack.i.h.bf16 %v713_v23 }
  0x89   :  { %v229_v49 = vsel %vm227_vm2, %v659_v45, %v660_v44 }
  0x8a   :  { %v266_v51 = vsel %vm262_vm1, %v664_v48, %v634_v33  ;;  %476 = vmatpush.msra.mxu2 %v229_v49  ;;  %v268_v52 = vsel %vm262_vm1, %v635_v32, %v665_v47  ;;  %v714_v32 = vunpack.i.l.bf16 %v713_v23 }
  0x8b   :  { %415 = vmatpush.msra.mxu0 %v266_v51  ;;  %531 = vmatpush.msrb.mxu1 %v268_v52 }
  0x8c   :  { %477 = vmatpush.msra.mxu2 %v197_v50 }
  0x8d   :  { %611 = vmatmul.msk.f32.gmra.mxu3 %vm402_vm4, %v939_v29  ;;  %607 = vmatmul.msk.f32.gmra.mxu1 %vm402_vm4, %v939_v29 }
  0x8e   :  { %v673_v54 = vpop.permute.xlu0 %672 }
  0x8f   :  { %v678_v58 = vpop.permute.xlu1 %677  ;;  %v675_v59 = vunpack.i.h.bf16 %v673_v54  ;;  %v674_v60 = vunpack.i.l.bf16 %v673_v54  ;;  %v951_v40 = vpop.permute.xlu2 %727 }
  0x90   :  { %v680_v61 = vunpack.i.h.bf16 %v678_v58  ;;  %v679_v62 = vunpack.i.l.bf16 %v678_v58  ;;  %v730_v46 = vunpack.i.h.bf16 %v951_v40 }
  0x91   :  { %v263_v63 = vsel %vm262_vm1, %v674_v60, %v644_v36  ;;  %v265_v3 = vsel %vm262_vm1, %v645_v35, %v675_v59 }
  0x92   :  { %416 = vmatpush.msra.mxu0 %v263_v63  ;;  %532 = vmatpush.msrb.mxu1 %v265_v3  ;;  %v194_v6 = vsel %vm192_vm3, %v679_v62, %v680_v61 }
  0x93   :  { %478 = vmatpush.msra.mxu2 %v194_v6 }
  0x94   :  { %417 = vmatpush.msra.mxu0 %v231_v8  ;;  %533 = vmatpush.msrb.mxu1 %v233_v9 }
  0x95   :  { %612 = vmatmul.msk.f32.gmra.mxu3 %vm402_vm4, %v961_v26  ;;  %608 = vmatmul.msk.f32.gmra.mxu1 %vm402_vm4, %v961_v26 }
  0x96   :  { %v688_v13 = vpop.permute.xlu0 %687 }
  0x97   :  { %v693_v14 = vpop.permute.xlu1 %692  ;;  %v690_v15 = vunpack.i.h.bf16 %v688_v13  ;;  %v689_v16 = vunpack.i.l.bf16 %v688_v13  ;;  %v743_v58 = vpop.permute.xlu2 %742 }
  0x98   :  { %v695_v17 = vunpack.i.h.bf16 %v693_v14  ;;  %v694_v20 = vunpack.i.l.bf16 %v693_v14  ;;  %v745_v60 = vunpack.i.h.bf16 %v743_v58 }
  0x99   :  { %v162_v24 = vsel %vm157_vm5, %v689_v16, %v690_v15 }
  0x9a   :  { %v228_v27 = vsel %vm227_vm2, %v694_v20, %v659_v45  ;;  %479 = vmatpush.msra.mxu2 %v162_v24  ;;  %v230_v28 = vsel %vm227_vm2, %v660_v44, %v695_v17  ;;  %v193_v44 = vsel %vm192_vm3, %v714_v32, %v679_v62  ;;  %v195_v45 = vsel %vm192_vm3, %v680_v61, %v715_v31 }
  0x9b   :  { %418 = vmatpush.msra.mxu0 %v228_v27  ;;  %534 = vmatpush.msrb.mxu1 %v230_v28  ;;  %v744_v61 = vunpack.i.l.bf16 %v743_v58 }
  0x9c   :  { %480 = vmatpush.msra.mxu2 %v159_v25 }
  0x9e   :  { %v703_v30 = vpop.permute.xlu0 %702 }
  0x9f   :  { %v708_v33 = vpop.permute.xlu1 %707  ;;  %v705_v34 = vunpack.i.h.bf16 %v703_v30  ;;  %v704_v35 = vunpack.i.l.bf16 %v703_v30  ;;  %v984_v17 = vpop.permute.xlu2 %757 }
  0xa0   :  { %v710_v36 = vunpack.i.h.bf16 %v708_v33  ;;  %v709_v37 = vunpack.i.l.bf16 %v708_v33  ;;  %v760_v20 = vunpack.i.h.bf16 %v984_v17  ;;  %v797_v33 = vmov 0  }
  0xa1   :  { %v196_v38 = vsel %vm192_vm3, %v704_v35, %v669_v42  ;;  %v198_v39 = vsel %vm192_vm3, %v670_v41, %v705_v34  ;;  %v729_v42 = vunpack.i.l.bf16 %v951_v40  ;;  %787 = vset.pattern.permute.xlu0 %v797_v33  ;;  %v379_v34 = vld [vmem:[%s1090_s2 + $0x8] sm:$0xff]  ;;  %788 = vset.pattern.permute.xlu1 %v797_v33 }
  0xa2   :  { %419 = vmatpush.msra.mxu0 %v196_v38  ;;  %535 = vmatpush.msrb.mxu1 %v198_v39  ;;  %v127_v43 = vsel %vm122_vm6, %v709_v37, %v710_v36 }
  0xa3   :  { %481 = vmatpush.msra.mxu2 %v127_v43  ;;  %v92_v54 = vsel %vm87_vm7, %v729_v42, %v730_v46  ;;  %389 = vperm.xlu0 %787, %v379_v34  }
  0xa4   :  { %420 = vmatpush.msra.mxu0 %v193_v44  ;;  %536 = vmatpush.msrb.mxu1 %v195_v45 }
  0xa5   :  { %786 = vset.pattern.permute.xlu2 %v797_v33 }
  0xa6   :  { %v718_v41 = vpop.permute.xlu0 %717 }
  0xa7   :  { %v723_v47 = vpop.permute.xlu1 %722  ;;  %v720_v48 = vunpack.i.h.bf16 %v718_v41  ;;  %v719_v49 = vunpack.i.l.bf16 %v718_v41  ;;  %v773_v35 = vpop.permute.xlu2 %772 }
  0xa8   :  { %v725_v50 = vunpack.i.h.bf16 %v723_v47  ;;  %v724_v51 = vunpack.i.l.bf16 %v723_v47  ;;  %v775_v41 = vunpack.i.h.bf16 %v773_v35  ;;  %v774_v47 = vunpack.i.l.bf16 %v773_v35 }
  0xa9   :  { %v124_v52 = vsel %vm122_vm6, %v719_v49, %v720_v48 }
  0xaa   :  { %v161_v56 = vsel %vm157_vm5, %v724_v51, %v689_v16  ;;  %482 = vmatpush.msra.mxu2 %v124_v52  ;;  %v163_v57 = vsel %vm157_vm5, %v690_v15, %v725_v50  ;;  %v126_v15 = vsel %vm122_vm6, %v744_v61, %v709_v37  ;;  %v128_v16 = vsel %vm122_vm6, %v710_v36, %v745_v60  ;;  %v316_v37 = vld [vmem:[%s1089_s1] sm:$0xff] }
  0xab   :  { %421 = vmatpush.msra.mxu0 %v161_v56  ;;  %537 = vmatpush.msrb.mxu1 %v163_v57 }
  0xac   :  { %483 = vmatpush.msra.mxu2 %v92_v54 }
  0xae   :  { %v733_v59 = vpop.permute.xlu0 %732 }
  0xaf   :  { %v738_v62 = vpop.permute.xlu1 %737  ;;  %v735_v63 = vunpack.i.h.bf16 %v733_v59  ;;  %v734_v3 = vunpack.i.l.bf16 %v733_v59  ;;  %v378_v59 = vld [vmem:[%s1090_s2] sm:$0xff] }
  0xb0   :  { %v740_v6 = vunpack.i.h.bf16 %v738_v62  ;;  %v739_v8 = vunpack.i.l.bf16 %v738_v62  ;;  %384 = vperm.xlu2 %786, %v378_v59  }
  0xb1   :  { %v158_v9 = vsel %vm157_vm5, %v734_v3, %v699_v11  ;;  %v160_v13 = vsel %vm157_vm5, %v700_v10, %v735_v63  ;;  %v759_v11 = vunpack.i.l.bf16 %v984_v17 }
  0xb2   :  { %422 = vmatpush.msra.mxu0 %v158_v9  ;;  %538 = vmatpush.msrb.mxu1 %v160_v13  ;;  %v89_v14 = vsel %vm87_vm7, %v739_v8, %v740_v6 }
  0xb3   :  { %484 = vmatpush.msra.mxu2 %v89_v14  ;;  %v54_v30 = vsel %vm52_vm8, %v759_v11, %v760_v20 }
  0xb4   :  { %423 = vmatpush.msra.mxu0 %v126_v15  ;;  %539 = vmatpush.msrb.mxu1 %v128_v16 }
  0xb6   :  { %v748_v55 = vpop.permute.xlu0 %747 }
  0xb7   :  { %v753_v10 = vpop.permute.xlu1 %752  ;;  %v750_v23 = vunpack.i.h.bf16 %v748_v55  ;;  %v749_v24 = vunpack.i.l.bf16 %v748_v55 }
  0xb8   :  { %v755_v25 = vunpack.i.h.bf16 %v753_v10  ;;  %v754_v27 = vunpack.i.l.bf16 %v753_v10 }
  0xb9   :  { %v57_v28 = vsel %vm52_vm8, %v749_v24, %v750_v23  ;;  %v56_v51 = vsel %vm52_vm8, %v774_v47, %v749_v24 }
  0xba   :  { %v123_v31 = vsel %vm122_vm6, %v754_v27, %v719_v49  ;;  %485 = vmatpush.msra.mxu2 %v57_v28  ;;  %v125_v32 = vsel %vm122_vm6, %v720_v48, %v755_v25 }
  0xbb   :  { %424 = vmatpush.msra.mxu0 %v123_v31  ;;  %540 = vmatpush.msrb.mxu1 %v125_v32 }
  0xbc   :  { %486 = vmatpush.msra.mxu2 %v54_v30 }
  0xbe   :  { %v763_v36 = vpop.permute.xlu0 %762  ;;  %487 = vmatpush.msra.mxu2 %v821_v0 }
  0xbf   :  { %v768_v38 = vpop.permute.xlu1 %767  ;;  %v765_v39 = vunpack.i.h.bf16 %v763_v36  ;;  %v764_v43 = vunpack.i.l.bf16 %v763_v36 }
  0xc0   :  { %v770_v44 = vunpack.i.h.bf16 %v768_v38  ;;  %v769_v45 = vunpack.i.l.bf16 %v768_v38  ;;  %488 = vmatpush.msra.mxu2 %v831_v2  ;;  %v380_v2 = vld [vmem:[%s1090_s2 + $0x10] sm:$0xff] }
  0xc1   :  { %v91_v48 = vsel %vm87_vm7, %v764_v43, %v729_v42  ;;  %v93_v0 = vsel %vm87_vm7, %v730_v46, %v765_v39  ;;  %489 = vmatmul.f32.vlgmr.msra.gmra.mxu2 %v316_v37  ;;  %v58_v42 = vsel %vm52_vm8, %v750_v23, %v775_v41  ;;  %394 = vperm.xlu1 %788, %v380_v2   ;;  %v318_v46 = vld [vmem:[%s1089_s1 + $0x10] sm:$0xff] }
  0xc2   :  { %425 = vmatpush.msra.mxu0 %v91_v48  ;;  %541 = vmatpush.msrb.mxu1 %v93_v0  ;;  %v88_v49 = vsel %vm87_vm7, %v769_v45, %v739_v8  ;;  %v90_v50 = vsel %vm87_vm7, %v740_v6, %v770_v44 }
  0xc4   :  { %426 = vmatpush.msra.mxu0 %v88_v49  ;;  %542 = vmatpush.msrb.mxu1 %v90_v50 }
  0xc6   :  { %v778_v40 = vpop.permute.xlu0 %777  ;;  %427 = vmatpush.msra.mxu0 %v56_v51  ;;  %543 = vmatpush.msrb.mxu1 %v58_v42 }
  0xc7   :  { %v783_v52 = vpop.permute.xlu1 %782  ;;  %v780_v54 = vunpack.i.h.bf16 %v778_v40  ;;  %v779_v56 = vunpack.i.l.bf16 %v778_v40 }
  0xc8   :  { %v785_v57 = vunpack.i.h.bf16 %v783_v52  ;;  %v784_v58 = vunpack.i.l.bf16 %v783_v52 }
  0xc9   :  { %v303_v60 = vsel %vm297_vm0, %v630_v19, %v779_v56  ;;  %492 = vmatmul.f32.gmra.mxu2 %v318_v46  ;;  %v300_v63 = vsel %vm297_vm0, %v640_v22, %v780_v54  ;;  %v381_v19 = vld [vmem:[%s1090_s2 + $0x18] sm:$0xff] }
  0xca   :  { %v53_v61 = vsel %vm52_vm8, %v784_v58, %v759_v11  ;;  %574 = vmatpush.msrb.mxu3 %v303_v60  ;;  %v55_v62 = vsel %vm52_vm8, %v760_v20, %v785_v57  ;;  %399 = vperm.xlu2 %786, %v381_v19  }
  0xcb   :  { %428 = vmatpush.msra.mxu0 %v53_v61  ;;  %544 = vmatpush.msrb.mxu1 %v55_v62 }
  0xcc   :  { %575 = vmatpush.msrb.mxu3 %v300_v63 }
  0xcd   :  { %429 = vmatpush.msra.mxu0 %v843_v5  ;;  %613 = vmatmul.msk.f32.vlgmr.msrb.gmra.mxu3 %vm402_vm4, %v904_v53  ;;  %v322_v5 = vld [vmem:[%s1089_s1 + $0x30] sm:$0xff] }
  0xce   :  { %545 = vmatpush.msrb.mxu1 %v826_v1 }
  0xcf   :  { %430 = vmatpush.msra.mxu0 %v850_v7 }
  0xd0   :  { %431 = vmatmul.f32.vlgmr.msra.gmra.mxu0 %v316_v37  ;;  %546 = vmatpush.msrb.mxu1 %v838_v4 }
  0xd1   :  { %495 = vmatmul.f32.gmra.mxu2 %v320_v18  ;;  %547 = vmatmul.f32.vlgmr.msrb.gmra.mxu1 %v316_v37 }
  0xd5   :  { %614 = vmatmul.msk.f32.gmra.mxu3 %vm402_vm4, %v922_v12 }
  0xd8   :  { %434 = vmatmul.f32.gmra.mxu0 %v318_v46 }
  0xd9   :  { %498 = vmatmul.f32.gmra.mxu2 %v322_v5  ;;  %550 = vmatmul.f32.gmra.mxu1 %v318_v46 }
  0xdd   :  { %615 = vmatmul.msk.f32.gmra.mxu3 %vm402_vm4, %v939_v29 }
  0xe0   :  { %437 = vmatmul.f32.gmra.mxu0 %v320_v18 }
  0xe1   :  { %553 = vmatmul.f32.gmra.mxu1 %v320_v18 }
  0xe5   :  { %616 = vmatmul.msk.f32.gmra.mxu3 %vm402_vm4, %v961_v26 }
  0xe8   :  { %440 = vmatmul.f32.gmra.mxu0 %v322_v5 }
  0xe9   :  { %556 = vmatmul.f32.gmra.mxu1 %v322_v5 }
  0xfa   :  { %v461_v1 = vpop.f32.mrf.mxu1 }
 0x100   :  { %v519_v4 = vpop.f32.mrf.mxu3 }
 0x102   :  { %v464_v7 = vpop.f32.mrf.mxu1 }
 0x108   :  { %v522_v21 = vpop.f32.mrf.mxu3 }
 0x10a   :  { %v467_v22 = vpop.f32.mrf.mxu1  ;;  %v385_v12 = vpop.permute.xlu2 %384 }
 0x110   :  { %v525_v53 = vpop.f32.mrf.mxu3 }
 0x112   :  { %v470_v6 = vpop.f32.mrf.mxu1 }
 0x115   :  { %v390_v29 = vpop.permute.xlu0 %389 }
 0x118   :  { %v528_v9 = vpop.f32.mrf.mxu3 }
 0x124   :  { %v400_v37 = vpop.permute.xlu2 %399 }
 0x133   :  { %v395_v24 = vpop.permute.xlu1 %394 }
 0x144   :  { %v490_v3 = vpop.f32.mrf.mxu2 }
 0x145   :  { %v491_v8 = vadd.f32 %v490_v3, %v385_v12 }
 0x147   :  { %v520_v13 = vadd.f32 %v519_v4, %v491_v8 }
 0x149   :  { %590 = vst [vmem:[%s1091_s3 + $0x8] sm:$0xff] %v520_v13 }
 0x14c   :  { %v493_v26 = vpop.f32.mrf.mxu2 }
 0x14d   :  { %v432_v14 = vpop.f32.mrf.mxu0  ;;  %v494_v15 = vadd.f32 %v493_v26, %v390_v29 }
 0x14e   :  { %v433_v16 = vadd.f32 %v432_v14, %v385_v12  ;;  %v548_v17 = vpop.f32.mrf.mxu1 }
 0x14f   :  { %v523_v20 = vadd.f32 %v522_v21, %v494_v15  ;;  %v549_v11 = vadd.f32 %v548_v17, %v385_v12 }
 0x150   :  { %v462_v55 = vadd.f32 %v461_v1, %v433_v16  ;;  %v577_v10 = vpop.f32.mrf.mxu3 }
 0x151   :  { %593 = vst [vmem:[%s1091_s3 + $0x20] sm:$0xff] %v523_v20  ;;  %v578_v23 = vadd.f32 %v577_v10, %v549_v11 }
 0x152   :  { %589 = vst [vmem:[%s1091_s3] sm:$0xff] %v462_v55 }
 0x153   :  { %591 = vst [vmem:[%s1091_s3 + $0x10] sm:$0xff] %v578_v23 }
 0x154   :  { %v496_v25 = vpop.f32.mrf.mxu2 }
 0x155   :  { %v435_v27 = vpop.f32.mrf.mxu0  ;;  %v497_v28 = vadd.f32 %v496_v25, %v395_v24 }
 0x156   :  { %v436_v30 = vadd.f32 %v435_v27, %v390_v29  ;;  %v551_v31 = vpop.f32.mrf.mxu1 }
 0x157   :  { %v526_v32 = vadd.f32 %v525_v53, %v497_v28  ;;  %v552_v33 = vadd.f32 %v551_v31, %v390_v29 }
 0x158   :  { %v465_v34 = vadd.f32 %v464_v7, %v436_v30  ;;  %v580_v35 = vpop.f32.mrf.mxu3 }
 0x159   :  { %596 = vst [vmem:[%s1091_s3 + $0x38] sm:$0xff] %v526_v32  ;;  %v581_v36 = vadd.f32 %v580_v35, %v552_v33 }
 0x15a   :  { %592 = vst [vmem:[%s1091_s3 + $0x18] sm:$0xff] %v465_v34 }
 0x15b   :  { %594 = vst [vmem:[%s1091_s3 + $0x28] sm:$0xff] %v581_v36 }
 0x15c   :  { %v499_v38 = vpop.f32.mrf.mxu2 }
 0x15d   :  { %v438_v39 = vpop.f32.mrf.mxu0  ;;  %v500_v43 = vadd.f32 %v499_v38, %v400_v37 }
 0x15e   :  { %v439_v44 = vadd.f32 %v438_v39, %v395_v24  ;;  %v554_v45 = vpop.f32.mrf.mxu1 }
 0x15f   :  { %v529_v41 = vadd.f32 %v528_v9, %v500_v43  ;;  %v555_v47 = vadd.f32 %v554_v45, %v395_v24 }
 0x160   :  { %v468_v48 = vadd.f32 %v467_v22, %v439_v44  ;;  %v583_v0 = vpop.f32.mrf.mxu3 }
 0x161   :  { %599 = vst [vmem:[%s1091_s3 + $0x50] sm:$0xff] %v529_v41  ;;  %v584_v49 = vadd.f32 %v583_v0, %v555_v47 }
 0x162   :  { %595 = vst [vmem:[%s1091_s3 + $0x30] sm:$0xff] %v468_v48 }
 0x163   :  { %597 = vst [vmem:[%s1091_s3 + $0x40] sm:$0xff] %v584_v49 }
 0x165   :  { %v441_v50 = vpop.f32.mrf.mxu0 }
 0x166   :  { %v442_v2 = vadd.f32 %v441_v50, %v400_v37  ;;  %v557_v51 = vpop.f32.mrf.mxu1 }
 0x167   :  { %v558_v42 = vadd.f32 %v557_v51, %v400_v37 }
 0x168   :  { %v471_v40 = vadd.f32 %v470_v6, %v442_v2  ;;  %v586_v46 = vpop.f32.mrf.mxu3 }
 0x169   :  { %v587_v52 = vadd.f32 %v586_v46, %v558_v42 }
 0x16a   :  { %598 = vst [vmem:[%s1091_s3 + $0x48] sm:$0xff] %v471_v40 }
 0x16b   :  { %600 = vst [vmem:[%s1091_s3 + $0x58] sm:$0xff] %v587_v52 }

</bundles_post_ra>
